<compile_context>
chip_gen: v6e
topology: v6e:2x2x1
jax: 0.10.0
libtpu: 0.0.40
codegen_flags: <defaults>
</compile_context>

<pallas_src>
import functools

import jax
import jax.numpy as jnp
from jax.experimental import pallas as pl
from jax.experimental.pallas import tpu as pltpu


def _round_up(x, m):
    return ((x + m - 1) // m) * m


def _has_two_tensorcores():
    # Only v7x exposes 2 TensorCores to a Pallas "parallel" grid axis;
    # v4/v5e/v5p/v6e behave as a single core from the kernel's view, where a
    # longer grid is a purely serial loop (pure overhead for tiny N).
    try:
        kind = jax.devices()[0].device_kind.lower()
    except Exception:  # pragma: no cover - defensive
        return False
    return "v7" in kind


def _quantile_layer_kernel(tau_ref, ints_ref, w1_ref, b1_ref, alpha_ref,
                           w2_ref, b2_ref, out_ref):
    # tau_ref: (tile, 1) f32; ints_ref: (1, D) f32 holding arange(D) * pi.
    tau = tau_ref[...]                                   # (tile, 1)
    ints_pi = ints_ref[...]                              # (1, D)

    # cos embedding: cos(tau * arange(D) * pi) -- pi already folded in (EUP).
    cos_emb = jnp.cos(tau * ints_pi)                     # (tile, D) f32

    # Linear 1 on the MXU: bf16 operands, f32 accumulation.
    h = jnp.dot(cos_emb.astype(jnp.bfloat16), w1_ref[...],
                preferred_element_type=jnp.float32) + b1_ref[...]

    # PReLU with a single shared parameter (nn.PReLU() default), f32 VPU.
    alpha = alpha_ref[0, 0]
    h = jnp.where(h >= 0.0, h, alpha * h)

    # Linear 2 on the MXU (lane-padded output): bf16 operands, f32 accumulate.
    y = jnp.dot(h.astype(jnp.bfloat16), w2_ref[...],
                preferred_element_type=jnp.float32) + b2_ref[...]

    # bf16, lane-dense (out_pad % 128 == 0) -> unmasked vst + half writeback.
    out_ref[...] = y.astype(out_ref.dtype)


@functools.partial(jax.jit, static_argnames=("tile_n",))
def quantile_layer(tau, w1, b1, alpha, w2, b2, *, tile_n=2048):
    """tau: arbitrary shape f32. Returns tau.shape + (num_output,) f32."""
    orig_shape = tau.shape
    d = w1.shape[0]                       # cos_embedding_dim
    num_output = w2.shape[1]
    out_pad = max(128, _round_up(num_output, 128))   # lane-dense output

    tau_flat = tau.reshape(-1, 1).astype(jnp.float32)   # (N, 1)
    n = tau_flat.shape[0]

    # Row tile: as large as requested (multiple of 16).  Single grid step
    # whenever the whole problem fits; only a 2-TC chip (v7x) gets a forced
    # 2-way split, and only when each half still has >= 256 rows.
    tile_req = max(16, _round_up(int(tile_n), 16))
    if _has_two_tensorcores() and n >= 512:
        half = _round_up(-(-n // 2), 16)
        tile = min(tile_req, half)
    else:
        tile = min(tile_req, _round_up(n, 16))
    tile = max(16, _round_up(tile, 16))

    n_pad = _round_up(n, tile)
    if n_pad != n:
        tau_flat = jnp.pad(tau_flat, ((0, n_pad - n), (0, 0)))
    grid = (n_pad // tile,)

    # Precompute arange(D) * pi as a (1, D) row (folds pi out of the kernel).
    ints_pi = (jnp.arange(d, dtype=jnp.float32) * jnp.pi).reshape(1, d)

    # bf16 weights for the MXU; biases stay f32 (added post-accumulation).
    w1_bf = w1.astype(jnp.bfloat16)
    w2_bf = jnp.pad(w2, ((0, 0), (0, out_pad - num_output))).astype(jnp.bfloat16)
    b1_f = b1.astype(jnp.float32)
    b2_f = jnp.pad(b2.astype(jnp.float32), ((0, 0), (0, out_pad - num_output)))
    alpha_f = alpha.astype(jnp.float32)

    cost = pl.CostEstimate(
        flops=2 * n_pad * d * d + 2 * n_pad * d * out_pad,
        transcendentals=n_pad * d,
        bytes_accessed=(n_pad * 4                 # tau in
                        + d * 4                   # arange*pi row
                        + d * d * 2               # W1 (bf16)
                        + d * 4                   # b1
                        + d * out_pad * 2         # W2 (bf16, padded)
                        + out_pad * 4             # b2
                        + n_pad * out_pad * 2),   # output (bf16)
    )

    out = pl.pallas_call(
        _quantile_layer_kernel,
        out_shape=jax.ShapeDtypeStruct((n_pad, out_pad), jnp.bfloat16),
        grid_spec=pltpu.PrefetchScalarGridSpec(
            num_scalar_prefetch=0,
            grid=grid,
            in_specs=[
                pl.BlockSpec((tile, 1), lambda i: (i, 0)),            # tau
                pl.BlockSpec((1, d), lambda i: (0, 0)),               # arange*pi
                pl.BlockSpec((d, d), lambda i: (0, 0)),               # W1 (bf16)
                pl.BlockSpec((1, d), lambda i: (0, 0)),               # b1
                pl.BlockSpec((1, 1), lambda i: (0, 0),
                             memory_space=pltpu.SMEM),                # prelu alpha
                pl.BlockSpec((d, out_pad), lambda i: (0, 0)),         # W2 (bf16, padded)
                pl.BlockSpec((1, out_pad), lambda i: (0, 0)),         # b2 (padded)
            ],
            out_specs=pl.BlockSpec((tile, out_pad), lambda i: (i, 0)),
        ),
        compiler_params=pltpu.CompilerParams(
            dimension_semantics=("parallel",),
            vmem_limit_bytes=32 << 20,   # lift v5e's 16 MiB scoped default
        ),
        cost_estimate=cost,
    )(tau_flat, ints_pi, w1_bf, b1_f, alpha_f, w2_bf, b2_f)

    # TODO(synk): for very large N, pack 128//num_output tau rows per 128-lane
    # output row in-kernel to avoid this padded-buffer slice pass entirely.
    out = out[:n, :num_output].astype(jnp.float32)
    return out.reshape(orig_shape + (num_output,))


def init_params(key, cos_embedding_dim=128, num_output=32):
    """Deterministic synthetic parameter init (shapes match nn.Module)."""
    k1, k2, k3, k4 = jax.random.split(key, 4)
    bound1 = 1.0 / jnp.sqrt(cos_embedding_dim)
    w1 = jax.random.uniform(k1, (cos_embedding_dim, cos_embedding_dim),
                            jnp.float32, -bound1, bound1)
    b1 = jax.random.uniform(k2, (1, cos_embedding_dim),
                            jnp.float32, -bound1, bound1)
    w2 = jax.random.uniform(k3, (cos_embedding_dim, num_output),
                            jnp.float32, -bound1, bound1)
    b2 = jax.random.uniform(k4, (1, num_output),
                            jnp.float32, -bound1, bound1)
    alpha = jnp.full((1, 1), 0.25, jnp.float32)  # nn.PReLU() default init
    return w1, b1, alpha, w2, b2


if __name__ == "__main__":
    cos_embedding_dim = 128
    num_output = 32
    batch, seq = 2, 8

    key = jax.random.PRNGKey(0)
    k_tau, k_par = jax.random.split(key)
    tau = jax.random.uniform(k_tau, (batch, seq), jnp.float32)  # quantile levels
    w1, b1, alpha, w2, b2 = init_params(k_par, cos_embedding_dim, num_output)

    out = quantile_layer(tau, w1, b1, alpha, w2, b2)
    jax.block_until_ready(out)

    # Pure-JAX f32 reference of the same math (kernel uses bf16 matmul
    # operands + bf16 output with f32 accumulation, so tolerance is widened).
    ints = jnp.arange(cos_embedding_dim, dtype=jnp.float32)
    cos_emb = jnp.cos(tau[..., None] * ints * jnp.pi)
    h = cos_emb @ w1 + b1[0]
    h = jnp.where(h >= 0.0, h, alpha[0, 0] * h)
    ref = h @ w2 + b2[0]
    assert out.shape == (batch, seq, num_output)
    assert jnp.allclose(out, ref, atol=3e-2, rtol=3e-2)

    print("KERNEL_OK")
</pallas_src>

<mosaic_0001>
module attributes {stable_mosaic.version = 11 : i64} {
  func.func @_quantile_layer_kernel(%arg0: i32, %arg1: memref<16x1xf32, #tpu.memory_space<vmem>>, %arg2: memref<1x128xf32, #tpu.memory_space<vmem>>, %arg3: memref<128x128xbf16, #tpu.memory_space<vmem>>, %arg4: memref<1x128xf32, #tpu.memory_space<vmem>>, %arg5: memref<1x1xf32, #tpu.memory_space<smem>>, %arg6: memref<128x128xbf16, #tpu.memory_space<vmem>>, %arg7: memref<1x128xf32, #tpu.memory_space<vmem>>, %arg8: memref<16x128xbf16, #tpu.memory_space<vmem>>) attributes {dimension_semantics = [#tpu.dimension_semantics<parallel>], iteration_bounds = array<i64: 1>, scalar_prefetch = 0 : i64, scratch_operands = 0 : i64, tpu.core_type = #tpu.core_type<tc>, window_params = [{transform_indices = @transform_0, window_bounds = array<i64: 16, 1>}, {pipeline_mode = #tpu.pipeline_mode<synchronous>, transform_indices = @transform_1, window_bounds = array<i64: 1, 128>}, {pipeline_mode = #tpu.pipeline_mode<synchronous>, transform_indices = @transform_2, window_bounds = array<i64: 128, 128>}, {pipeline_mode = #tpu.pipeline_mode<synchronous>, transform_indices = @transform_3, window_bounds = array<i64: 1, 128>}, {transform_indices = @transform_4, window_bounds = array<i64: 1, 1>}, {pipeline_mode = #tpu.pipeline_mode<synchronous>, transform_indices = @transform_5, window_bounds = array<i64: 128, 128>}, {pipeline_mode = #tpu.pipeline_mode<synchronous>, transform_indices = @transform_6, window_bounds = array<i64: 1, 128>}, {transform_indices = @transform_7, window_bounds = array<i64: 16, 128>}]} {
    %c0 = arith.constant 0 : index
    %c0_0 = arith.constant 0 : index
    %0 = vector.load %arg1[%c0, %c0_0] : memref<16x1xf32, #tpu.memory_space<vmem>>, vector<16x1xf32>
    %c0_1 = arith.constant 0 : index
    %c0_2 = arith.constant 0 : index
    %1 = vector.load %arg2[%c0_1, %c0_2] : memref<1x128xf32, #tpu.memory_space<vmem>>, vector<1x128xf32>
    %2 = vector.broadcast %0 : vector<16x1xf32> to vector<16x128xf32>
    %3 = vector.broadcast %1 : vector<1x128xf32> to vector<16x128xf32>
    %4 = arith.mulf %2, %3 : vector<16x128xf32>
    %5 = math.cos %4 : vector<16x128xf32>
    %6 = arith.truncf %5 : vector<16x128xf32> to vector<16x128xbf16>
    %c0_3 = arith.constant 0 : index
    %c0_4 = arith.constant 0 : index
    %7 = vector.load %arg3[%c0_3, %c0_4] : memref<128x128xbf16, #tpu.memory_space<vmem>>, vector<128x128xbf16>
    %cst = arith.constant dense<0.000000e+00> : vector<16x128xf32>
    %8 = tpu.matmul %6, %7, %cst {dimension_numbers = #tpu.dot_dimension_numbers<[1], [0], [0], [1], [0, 0, 1, 1], [], []>} : vector<16x128xbf16>, vector<128x128xbf16>, vector<16x128xf32> -> vector<16x128xf32>
    %c0_5 = arith.constant 0 : index
    %c0_6 = arith.constant 0 : index
    %9 = vector.load %arg4[%c0_5, %c0_6] : memref<1x128xf32, #tpu.memory_space<vmem>>, vector<1x128xf32>
    %10 = vector.broadcast %9 : vector<1x128xf32> to vector<16x128xf32>
    %11 = arith.addf %8, %10 : vector<16x128xf32>
    %c0_7 = arith.constant 0 : index
    %c0_8 = arith.constant 0 : index
    %12 = memref.load %arg5[%c0_7, %c0_8] : memref<1x1xf32, #tpu.memory_space<smem>>
    %cst_9 = arith.constant 0.000000e+00 : f32
    %13 = vector.broadcast %cst_9 : f32 to vector<16x128xf32>
    %14 = arith.cmpf oge, %11, %13 : vector<16x128xf32>
    %15 = vector.broadcast %12 : f32 to vector<16x128xf32>
    %16 = arith.mulf %15, %11 : vector<16x128xf32>
    %17 = arith.select %14, %11, %16 : vector<16x128xi1>, vector<16x128xf32>
    %18 = arith.truncf %17 : vector<16x128xf32> to vector<16x128xbf16>
    %c0_10 = arith.constant 0 : index
    %c0_11 = arith.constant 0 : index
    %19 = vector.load %arg6[%c0_10, %c0_11] : memref<128x128xbf16, #tpu.memory_space<vmem>>, vector<128x128xbf16>
    %cst_12 = arith.constant dense<0.000000e+00> : vector<16x128xf32>
    %20 = tpu.matmul %18, %19, %cst_12 {dimension_numbers = #tpu.dot_dimension_numbers<[1], [0], [0], [1], [0, 0, 1, 1], [], []>} : vector<16x128xbf16>, vector<128x128xbf16>, vector<16x128xf32> -> vector<16x128xf32>
    %c0_13 = arith.constant 0 : index
    %c0_14 = arith.constant 0 : index
    %21 = vector.load %arg7[%c0_13, %c0_14] : memref<1x128xf32, #tpu.memory_space<vmem>>, vector<1x128xf32>
    %22 = vector.broadcast %21 : vector<1x128xf32> to vector<16x128xf32>
    %23 = arith.addf %20, %22 : vector<16x128xf32>
    %24 = arith.truncf %23 : vector<16x128xf32> to vector<16x128xbf16>
    %c0_15 = arith.constant 0 : index
    %c0_16 = arith.constant 0 : index
    %25 = vector.load %arg8[%c0_15, %c0_16] : memref<16x128xbf16, #tpu.memory_space<vmem>>, vector<16x128xbf16>
    tpu.vector_store %arg8[%c0_15, %c0_16], %24 {strides = array<i32>} : memref<16x128xbf16, #tpu.memory_space<vmem>>, vector<16x128xbf16>,
    return
  }
  func.func @transform_0(%arg0: i32) -> (i32, i32) {
    %c0_i32 = arith.constant 0 : i32
    %c0_i32_0 = arith.constant 0 : i32
    return %arg0, %c0_i32 : i32, i32
  }
  func.func @transform_1(%arg0: i32) -> (i32, i32) {
    %c0_i32 = arith.constant 0 : i32
    %c0_i32_0 = arith.constant 0 : i32
    %c0_i32_1 = arith.constant 0 : i32
    return %c0_i32, %c0_i32_0 : i32, i32
  }
  func.func @transform_2(%arg0: i32) -> (i32, i32) {
    %c0_i32 = arith.constant 0 : i32
    %c0_i32_0 = arith.constant 0 : i32
    %c0_i32_1 = arith.constant 0 : i32
    return %c0_i32, %c0_i32_0 : i32, i32
  }
  func.func @transform_3(%arg0: i32) -> (i32, i32) {
    %c0_i32 = arith.constant 0 : i32
    %c0_i32_0 = arith.constant 0 : i32
    %c0_i32_1 = arith.constant 0 : i32
    return %c0_i32, %c0_i32_0 : i32, i32
  }
  func.func @transform_4(%arg0: i32) -> (i32, i32) {
    %c0_i32 = arith.constant 0 : i32
    %c0_i32_0 = arith.constant 0 : i32
    %c0_i32_1 = arith.constant 0 : i32
    return %c0_i32, %c0_i32_0 : i32, i32
  }
  func.func @transform_5(%arg0: i32) -> (i32, i32) {
    %c0_i32 = arith.constant 0 : i32
    %c0_i32_0 = arith.constant 0 : i32
    %c0_i32_1 = arith.constant 0 : i32
    return %c0_i32, %c0_i32_0 : i32, i32
  }
  func.func @transform_6(%arg0: i32) -> (i32, i32) {
    %c0_i32 = arith.constant 0 : i32
    %c0_i32_0 = arith.constant 0 : i32
    %c0_i32_1 = arith.constant 0 : i32
    return %c0_i32, %c0_i32_0 : i32, i32
  }
  func.func @transform_7(%arg0: i32) -> (i32, i32) {
    %c0_i32 = arith.constant 0 : i32
    %c0_i32_0 = arith.constant 0 : i32
    return %arg0, %c0_i32 : i32, i32
  }
}

</mosaic_0001>

<bundles_post_ra>
// kernel: quantile_layer.1
= control target key start
LH: loop header
LB: loop body
LE: loop exit
PB: predicated region body
PF: predicated region fallthrough
CT: control target
= control target key end

     0   :  { %v639_v0 = vmov 0   ;;  %v640_v4 = vmov 0.0   ;;  %vm641_vm0 = vmmov 0   ;;  %v642_v38 = vmov 683565275   ;;  %s860_s0 = inlined_call_operand.vmem [shape: f32[16,1], index: 0, kind: input, shape index: {}]   ;;  %s861_s2 = inlined_call_operand.vmem [shape: bf16[128,128], index: 2, kind: input, shape index: {}]   ;;  %s862_s5 = inlined_call_operand.vmem [shape: bf16[128,128], index: 5, kind: input, shape index: {}]   ;;  %s863_s1 = inlined_call_operand.vmem [shape: f32[1,128], index: 1, kind: input, shape index: {}]   ;;  %s864_s3 = inlined_call_operand.vmem [shape: f32[1,128], index: 3, kind: input, shape index: {}]   ;;  %s865_s4 = inlined_call_operand.<no memory space> [shape: f32[1,1], index: 4, kind: input, shape index: {}]   ;;  %s866_s6 = inlined_call_operand.vmem [shape: f32[1,128], index: 6, kind: input, shape index: {}]   ;;  %s867_s7 = inlined_call_operand.vmem [shape: bf16[16,128], index: 7, kind: output, shape index: {}]  }
   0x1   :  { %614 = vset.pattern.permute.xlu0 %v639_v0  ;;  %v28_v1 = vld [vmem:[%s860_s0] sm:$0xff]  ;;  %v29_v2 = vld [vmem:[%s860_s0 + $0x8] sm:$0xff]  ;;  %v615_v3 = vld [vmem:[%s861_s2 + $0x38] sm:$0xff]   ;;  %557 = vmatprep.subr.bf16.mxu0 %v640_v4  ;;  %v643_v42 = vmov 2475754826  }
   0x2   :  { %33 = vperm.xlu0 %614, %v28_v1   ;;  %577 = vmatprep.subr.bf16.mxu1 %v640_v4  ;;  %v616_v5 = vld [vmem:[%s861_s2 + $0x30] sm:$0xff]   ;;  %v617_v6 = vld [vmem:[%s861_s2 + $0x28] sm:$0xff]   ;;  %v618_v7 = vld [vmem:[%s861_s2 + $0x20] sm:$0xff]   ;;  %v644_v44 = vmov 2131351028  }
   0x3   :  { %558 = vmatpush3.bf16.msra.mxu0 %v615_v3  ;;  %573 = vmatprep.mubr.msk.bf16.mxu0 %vm641_vm0, %v640_v4  ;;  %v619_v8 = vld [vmem:[%s861_s2 + $0x18] sm:$0xff]   ;;  %v620_v9 = vld [vmem:[%s861_s2 + $0x10] sm:$0xff]   ;;  %v621_v10 = vld [vmem:[%s861_s2 + $0x8] sm:$0xff]   ;;  %v645_v46 = vmov 2102212464  }
   0x4   :  { %559 = vmatprep.subr.bf16.mxu0 %v640_v4  ;;  %593 = vmatprep.mubr.msk.bf16.mxu1 %vm641_vm0, %v640_v4  ;;  %v622_v11 = vld [vmem:[%s861_s2] sm:$0xff]   ;;  %v623_v12 = vld [vmem:[%s862_s5 + $0x38] sm:$0xff]   ;;  %v624_v13 = vld [vmem:[%s862_s5 + $0x30] sm:$0xff]   ;;  %v646_v48 = vmov 920167782  }
   0x5   :  { %578 = vmatpush3.bf16.msra.mxu1 %v623_v12  ;;  %v625_v14 = vld [vmem:[%s862_s5 + $0x28] sm:$0xff]   ;;  %v626_v15 = vld [vmem:[%s862_s5 + $0x20] sm:$0xff]   ;;  %v627_v16 = vld [vmem:[%s862_s5 + $0x18] sm:$0xff]   ;;  %v647_v55 = vmov 1326507024  }
   0x6   :  { %38 = vperm.xlu0 %614, %v29_v2   ;;  %579 = vmatprep.subr.bf16.mxu1 %v640_v4  ;;  %v503_v17 = vld [vmem:[%s863_s1] ss:$0 sm:$0xff] }
   0x7   :  { %560 = vmatpush3.bf16.msra.mxu0 %v616_v5 }
   0x8   :  { %561 = vmatprep.subr.bf16.mxu0 %v640_v4 }
   0x9   :  { %580 = vmatpush3.bf16.msra.mxu1 %v624_v13 }
   0xa   :  { %581 = vmatprep.subr.bf16.mxu1 %v640_v4 }
   0xb   :  { %562 = vmatpush3.bf16.msra.mxu0 %v617_v6 }
   0xc   :  { %563 = vmatprep.subr.bf16.mxu0 %v640_v4 }
   0xd   :  { %582 = vmatpush3.bf16.msra.mxu1 %v625_v14 }
   0xe   :  { %583 = vmatprep.subr.bf16.mxu1 %v640_v4 }
   0xf   :  { %564 = vmatpush3.bf16.msra.mxu0 %v618_v7 }
  0x10   :  { %565 = vmatprep.subr.bf16.mxu0 %v640_v4 }
  0x11   :  { %584 = vmatpush3.bf16.msra.mxu1 %v626_v15 }
  0x12   :  { %585 = vmatprep.subr.bf16.mxu1 %v640_v4 }
  0x13   :  { %566 = vmatpush3.bf16.msra.mxu0 %v619_v8 }
  0x14   :  { %567 = vmatprep.subr.bf16.mxu0 %v640_v4 }
  0x15   :  { %586 = vmatpush3.bf16.msra.mxu1 %v627_v16 }
  0x16   :  { %587 = vmatprep.subr.bf16.mxu1 %v640_v4 }
  0x17   :  { %568 = vmatpush3.bf16.msra.mxu0 %v620_v9 }
  0x18   :  { %569 = vmatprep.subr.bf16.mxu0 %v640_v4 }
  0x1b   :  { %570 = vmatpush3.bf16.msra.mxu0 %v621_v10 }
  0x1c   :  { %571 = vmatprep.subr.bf16.mxu0 %v640_v4 }
  0x1f   :  { %572 = vmatpush3.bf16.msra.mxu0 %v622_v11 }
  0x7d   :  { %v34_v18 = vpop.permute.xlu0 %33 }
  0x7e   :  { %v752_v19 = vmul.f32 %v503_v17, %v34_v18 }
  0x80   :  { %v49_v20 = vand.u32 2147483647, %v752_v19  ;;  %v52_v21 = vand.u32 2139095040, %v752_v19  ;;  %vm51_vm15 = vcmp.lt.s32.totalorder %v752_v19, 0 }
  0x81   :  { %v39_v22 = vpop.permute.xlu0 %38 }
  0x82   :  { %v53_v23 = vshrl.u32 %v52_v21, 23  ;;  %v756_v24 = vmul.f32 %v503_v17, %v39_v22  ;;  %v56_v25 = vand.u32 8388607, %v49_v20  ;;  %vm810_vm0 = vcmp.le.f32.partialorder %v49_v20, 0.7853982 }
  0x84   :  { %v504_v26 = vadd.s32 4294967169, %v53_v23  ;;  %v155_v27 = vand.u32 2139095040, %v756_v24  ;;  %v57_v29 = vor.u32 8388608, %v56_v25  ;;  %v152_v31 = vand.u32 2147483647, %v756_v24 }
  0x86   :  { %v59_v28 = vadd.s32 1, %v504_v26  ;;  %v156_v30 = vshrl.u32 %v155_v27, 23  ;;  %v762_v36 = vshll.u32 %v57_v29, 8  ;;  %v159_v40 = vand.u32 8388607, %v152_v31 }
  0x88   :  { %vm60_vm1 = vcmp.gt.s32.totalorder %v59_v28, 0  ;;  %v508_v33 = vadd.s32 4294967169, %v156_v30  ;;  %v160_v7 = vor.u32 8388608, %v159_v40 }
  0x89   :  { %v61_v32 = vsel %vm60_vm1, %v59_v28, 0  ;;  %vm154_vm1 = vcmp.lt.s32.totalorder %v756_v24, 0 }
  0x8a   :  { %v62_v34 = vshrl.u32 %v61_v32, 5  ;;  %v63_v35 = vand.u32 31, %v61_v32  ;;  %v162_v41 = vadd.s32 1, %v508_v33  ;;  %v200_v22 = vshll.u32 %v160_v7, 8 }
  0x8c   :  { %v64_v37 = vsub.s32 32, %v63_v35  ;;  %v66_v39 = vshll.u32 %v642_v38, %v63_v35  ;;  %v69_v43 = vshll.u32 %v643_v42, %v63_v35  ;;  %v72_v45 = vshll.u32 %v644_v44, %v63_v35 }
  0x8d   :  { %v75_v47 = vshll.u32 %v645_v46, %v63_v35  ;;  %v78_v49 = vshll.u32 %v646_v48, %v63_v35  ;;  %vm81_vm2 = vcmp.lt.s32.totalorder %v62_v34, 1  ;;  %vm83_vm3 = vcmp.lt.s32.totalorder %v62_v34, 3 }
  0x8e   :  { %v67_v50 = vshrl.u32 %v643_v42, %v64_v37  ;;  %v70_v51 = vshrl.u32 %v644_v44, %v64_v37  ;;  %v73_v52 = vshrl.u32 %v645_v46, %v64_v37  ;;  %v65_v53 = vshrl.u32 %v642_v38, %v64_v37 }
  0x8f   :  { %v76_v54 = vshrl.u32 %v646_v48, %v64_v37  ;;  %v79_v56 = vshrl.u32 %v647_v55, %v64_v37  ;;  %vm163_vm4 = vcmp.gt.s32.totalorder %v162_v41, 0  ;;  %vm84_vm5 = vcmp.lt.s32.totalorder %v62_v34, 4 }
  0x90   :  { %v68_v57 = vor.u32 %v67_v50, %v66_v39  ;;  %v71_v58 = vor.u32 %v70_v51, %v69_v43  ;;  %v74_v59 = vor.u32 %v73_v52, %v72_v45  ;;  %v164_v62 = vsel %vm163_vm4, %v162_v41, 0 }
  0x91   :  { %v77_v60 = vor.u32 %v76_v54, %v75_v47  ;;  %v80_v61 = vor.u32 %v79_v56, %v78_v49  ;;  %vm82_vm6 = vcmp.lt.s32.totalorder %v62_v34, 2  ;;  %v166_v10 = vand.u32 31, %v164_v62 }
  0x92   :  { %v85_v63 = vsel %vm81_vm2, %v65_v53, %v68_v57  ;;  %v86_v0 = vsel %vm84_vm5, %v74_v59, 2102212464  ;;  %v89_v1 = vsel %vm81_vm2, %v68_v57, %v71_v58  ;;  %v93_v2 = vsel %vm81_vm2, %v71_v58, %v74_v59 }
  0x93   :  { %v87_v3 = vsel %vm83_vm3, %v71_v58, %v86_v0  ;;  %v90_v5 = vsel %vm84_vm5, %v77_v60, 920167782  ;;  %v94_v6 = vsel %vm84_vm5, %v80_v61, 1326507024  ;;  %v165_v18 = vshrl.u32 %v164_v62, 5 }
  0x94   :  { %v91_v8 = vsel %vm83_vm3, %v74_v59, %v90_v5  ;;  %v95_v9 = vsel %vm83_vm3, %v77_v60, %v94_v6  ;;  %v88_v11 = vsel %vm82_vm6, %v85_v63, %v87_v3  ;;  %v167_v21 = vsub.s32 32, %v166_v10 }
  0x95   :  { %v92_v12 = vsel %vm82_vm6, %v89_v1, %v91_v8  ;;  %v96_v13 = vsel %vm82_vm6, %v93_v2, %v95_v9  ;;  %v104_v23 = vmul.u32 %v762_v36, %v88_v11  ;;  %v169_v25 = vshll.u32 %v642_v38, %v166_v10 }
  0x96   :  { %v775_v14 = vmul.u32.u64.low %v762_v36, %v96_v13  ;;  %v776_v15 = vmul.u32.u64.high %v762_v36, %v96_v13, %v775_v14  ;;  %v779_v16 = vmul.u32.u64.low %v762_v36, %v92_v12  ;;  %v780_v17 = vmul.u32.u64.high %v762_v36, %v92_v12, %v779_v16 }
  0x97   :  { %v172_v26 = vshll.u32 %v643_v42, %v166_v10  ;;  %v175_v27 = vshll.u32 %v644_v44, %v166_v10  ;;  %v170_v28 = vshrl.u32 %v643_v42, %v167_v21  ;;  %v173_v29 = vshrl.u32 %v644_v44, %v167_v21 }
  0x98   :  { %v176_v30 = vshrl.u32 %v645_v46, %v167_v21  ;;  %v178_v32 = vshll.u32 %v645_v46, %v166_v10  ;;  %vm106_vm7 = vc.u32 %v776_v15, %v779_v16  ;;  %v107_v33 = vadd.s32 1, %v780_v17 }
  0x99   :  { %v179_v34 = vshrl.u32 %v646_v48, %v167_v21  ;;  %v181_v35 = vshll.u32 %v646_v48, %v166_v10  ;;  %v171_v37 = vor.u32 %v170_v28, %v169_v25  ;;  %v174_v39 = vor.u32 %v173_v29, %v172_v26 }
  0x9a   :  { %v177_v40 = vor.u32 %v176_v30, %v175_v27  ;;  %v182_v41 = vshrl.u32 %v647_v55, %v167_v21  ;;  %v108_v36 = vsel %vm106_vm7, %v107_v33, %v780_v17  ;;  %vm184_vm8 = vcmp.lt.s32.totalorder %v165_v18, 1 }
  0x9b   :  { %v180_v43 = vor.u32 %v179_v34, %v178_v32  ;;  %vm187_vm9 = vcmp.lt.s32.totalorder %v165_v18, 4  ;;  %v109_v42 = vadd.s32 %v108_v36, %v104_v23  ;;  %vm186_vm10 = vcmp.lt.s32.totalorder %v165_v18, 3 }
  0x9c   :  { %v183_v44 = vor.u32 %v182_v41, %v181_v35  ;;  %v189_v45 = vsel %vm187_vm9, %v177_v40, 2102212464  ;;  %v168_v46 = vshrl.u32 %v642_v38, %v167_v21  ;;  %v192_v47 = vsel %vm184_vm8, %v171_v37, %v174_v39 }
  0x9d   :  { %v193_v49 = vsel %vm187_vm9, %v180_v43, 920167782  ;;  %v196_v50 = vsel %vm184_vm8, %v174_v39, %v177_v40  ;;  %v110_v51 = vadd.s32 536870912, %v109_v42  ;;  %vm185_vm11 = vcmp.lt.s32.totalorder %v165_v18, 2 }
  0x9e   :  { %v194_v48 = vsel %vm186_vm10, %v177_v40, %v193_v49  ;;  %v197_v52 = vsel %vm187_vm9, %v183_v44, 1326507024  ;;  %v188_v53 = vsel %vm184_vm8, %v168_v46, %v171_v37  ;;  %v190_v54 = vsel %vm186_vm10, %v174_v39, %v189_v45 }
  0x9f   :  { %v195_v55 = vsel %vm185_vm11, %v192_v47, %v194_v48  ;;  %v198_v56 = vsel %vm186_vm10, %v180_v43, %v197_v52  ;;  %v790_v57 = vshrl.u32 %v110_v51, 30  ;;  %v191_v63 = vsel %vm185_vm11, %v188_v53, %v190_v54 }
  0xa0   :  { %v199_v58 = vsel %vm185_vm11, %v196_v50, %v198_v56  ;;  %v792_v59 = vmul.u32.u64.low %v200_v22, %v195_v55  ;;  %v793_v60 = vmul.u32.u64.high %v200_v22, %v195_v55, %v792_v59  ;;  %v207_v2 = vmul.u32 %v200_v22, %v191_v63 }
  0xa1   :  { %v795_v61 = vmul.u32.u64.low %v200_v22, %v199_v58  ;;  %v796_v62 = vmul.u32.u64.high %v200_v22, %v199_v58, %v795_v61  ;;  %v112_v38 = vshll.u32 %v790_v57, 30  ;;  %v105_v17 = vadd.s32 %v779_v16, %v776_v15 }
  0xa2   :  { %v210_v1 = vadd.s32 1, %v793_v60  ;;  %vm820_vm2 = vcmp.le.f32.partialorder %v152_v31, 0.7853982  ;;  %v135_v55 = vsub.s32 4, %v790_v57  ;;  %vm141_vm9 = vweird.f32 %v752_v19 }
  0xa3   :  { %v113_v0 = vsub.s32 %v109_v42, %v112_v38  ;;  %vm209_vm12 = vc.u32 %v796_v62, %v792_v59  ;;  %v208_v40 = vadd.s32 %v792_v59, %v796_v62  ;;  %vm244_vm10 = vweird.f32 %v756_v24 }
  0xa4   :  { %v211_v5 = vsel %vm209_vm12, %v210_v1, %v793_v60  ;;  %v136_v59 = vsel %vm51_vm15, %v135_v55, %v790_v57 }
  0xa5   :  { %v115_v3 = vsub.s32 0, %v113_v0  ;;  %v212_v6 = vadd.s32 %v211_v5, %v207_v2  ;;  %v138_v31 = vsel %vm810_vm0, 0, %v136_v59 }
  0xa6   :  { %v142_v38 = vand.u32 3, %v138_v31 }
  0xa7   :  { %v505_v7 = vmin.u32 %v115_v3, %v113_v0  ;;  %v213_v8 = vadd.s32 536870912, %v212_v6 }
  0xa8   :  { %vm144_vm3 = vcmp.eq.s32.totalorder %v142_v38, 0  ;;  %vm147_vm4 = vcmp.eq.s32.totalorder %v142_v38, 2  ;;  %vm143_vm5 = vcmp.lt.s32.totalorder %v142_v38, 2 }
  0xa9   :  { %v117_v9 = vclz %v505_v7  ;;  %v214_v10 = vshrl.u32 %v213_v8, 30 }
  0xab   :  { %v506_v11 = vadd.s32 4294967294, %v117_v9  ;;  %v215_v12 = vshll.u32 %v214_v10, 30  ;;  %v238_v58 = vsub.s32 4, %v214_v10 }
  0xad   :  { %vm507_vm13 = vcmp.lt.s32.totalorder %v506_v11, 0  ;;  %v216_v14 = vsub.s32 %v212_v6, %v215_v12  ;;  %v239_v61 = vsel %vm154_vm1, %v238_v58, %v214_v10 }
  0xae   :  { %v120_v13 = vsel %vm507_vm13, 0, %v506_v11  ;;  %v241_v63 = vsel %vm820_vm2, 0, %v239_v61 }
  0xaf   :  { %v121_v18 = vsub.s32 32, %v120_v13  ;;  %v125_v21 = vsub.s32 4294967266, %v120_v13  ;;  %v218_v22 = vsub.s32 0, %v216_v14  ;;  %v122_v23 = vshll.u32 %v113_v0, %v120_v13 }
  0xb0   :  { %v245_v2 = vand.u32 3, %v241_v63 }
  0xb1   :  { %v123_v25 = vshrl.u32 %v105_v17, %v121_v18  ;;  %v126_v26 = vadd.s32 127, %v125_v21  ;;  %v509_v27 = vmin.u32 %v218_v22, %v216_v14  ;;  %v628_v18 = vld [vmem:[%s862_s5 + $0x10] sm:$0xff]   ;;  %v629_v21 = vld [vmem:[%s862_s5 + $0x8] sm:$0xff]  }
  0xb2   :  { %vm250_vm6 = vcmp.eq.s32.totalorder %v245_v2, 2  ;;  %vm247_vm7 = vcmp.eq.s32.totalorder %v245_v2, 0  ;;  %vm246_vm8 = vcmp.lt.s32.totalorder %v245_v2, 2  ;;  %588 = vmatpush3.bf16.msra.mxu1 %v628_v18 }
  0xb3   :  { %v124_v28 = vor.u32 %v123_v25, %v122_v23  ;;  %v127_v29 = vshll.u32 %v126_v26, 23  ;;  %v220_v30 = vclz %v509_v27  ;;  %589 = vmatprep.subr.bf16.mxu1 %v640_v4  ;;  %v371_v25 = vstv %s865_s4 }
  0xb5   :  { %v128_v32 = vor.u32 4788187, %v127_v29  ;;  %v510_v33 = vadd.s32 4294967294, %v220_v30  ;;  %v131_v35 = vcvt.s32.f32 %v124_v28 }
  0xb6   :  { %590 = vmatpush3.bf16.msra.mxu1 %v629_v21 }
  0xb7   :  { %v129_v34 = vand.u32 2147483647, %v128_v32  ;;  %vm511_vm14 = vcmp.lt.s32.totalorder %v510_v33, 0  ;;  %591 = vmatprep.subr.bf16.mxu1 %v640_v4 }
  0xb8   :  { %v223_v39 = vsel %vm511_vm14, 0, %v510_v33 }
  0xb9   :  { %v132_v37 = vmul.f32 %v131_v35, %v129_v34  ;;  %v224_v15 = vsub.s32 32, %v223_v39  ;;  %v228_v16 = vsub.s32 4294967266, %v223_v39  ;;  %v225_v36 = vshll.u32 %v216_v14, %v223_v39 }
  0xbb   :  { %v133_v41 = vxor.u32 2147483648, %v132_v37  ;;  %v226_v43 = vshrl.u32 %v208_v40, %v224_v15  ;;  %v229_v42 = vadd.s32 127, %v228_v16 }
  0xbd   :  { %v134_v44 = vsel %vm51_vm15, %v133_v41, %v132_v37  ;;  %v227_v46 = vor.u32 %v226_v43, %v225_v36  ;;  %v230_v47 = vshll.u32 %v229_v42, 23  ;;  %v521_v37 = vld [vmem:[%s866_s6] ss:$0 sm:$0xff] }
  0xbe   :  { %v137_v49 = vsel %vm810_vm0, %v752_v19, %v134_v44  ;;  %v630_v19 = vld [vmem:[%s862_s5] sm:$0xff]  }
  0xbf   :  { %v231_v50 = vor.u32 4788187, %v230_v47  ;;  %631 = vcosq.f32 %v137_v49  ;;  %v234_v48 = vcvt.s32.f32 %v227_v46  ;;  %592 = vmatpush3.bf16.msra.mxu1 %v630_v19 }
  0xc0   :  { %633 = vsinq.f32 %v137_v49 }
  0xc1   :  { %v232_v51 = vand.u32 2147483647, %v231_v50 }
  0xc3   :  { %v235_v52 = vmul.f32 %v234_v48, %v232_v51 }
  0xc5   :  { %v236_v53 = vxor.u32 2147483648, %v235_v52 }
  0xc7   :  { %v237_v54 = vsel %vm154_vm1, %v236_v53, %v235_v52 }
  0xc8   :  { %v240_v56 = vsel %vm820_vm2, %v756_v24, %v237_v54  ;;  %v512_v24 = vld [vmem:[%s864_s3] ss:$0 sm:$0xff] }
  0xc9   :  { %635 = vcosq.f32 %v240_v56 }
  0xca   :  { %637 = vsinq.f32 %v240_v56 }
  0xcc   :  { %v632_v60 = vpop.eup %631 }
  0xcd   :  { %v634_v62 = vpop.eup %633  ;;  %v148_v1 = vxor.u32 2147483648, %v632_v60 }
  0xce   :  { %v145_v0 = vxor.u32 2147483648, %v634_v62 }
  0xcf   :  { %v149_v6 = vsel %vm147_vm4, %v148_v1, %v634_v62 }
  0xd0   :  { %v146_v5 = vsel %vm144_vm3, %v632_v60, %v145_v0 }
  0xd1   :  { %v150_v9 = vsel %vm143_vm5, %v146_v5, %v149_v6 }
  0xd2   :  { %v151_v13 = vsel %vm141_vm9, nan, %v150_v9 }
  0xd6   :  { %v636_v3 = vpop.eup %635 }
  0xd7   :  { %v638_v7 = vpop.eup %637  ;;  %v251_v57 = vxor.u32 2147483648, %v636_v3 }
  0xd8   :  { %v248_v8 = vxor.u32 2147483648, %v638_v7 }
  0xd9   :  { %v252_v10 = vsel %vm250_vm6, %v251_v57, %v638_v7 }
  0xda   :  { %v249_v11 = vsel %vm247_vm7, %v636_v3, %v248_v8 }
  0xdb   :  { %v253_v12 = vsel %vm246_vm8, %v249_v11, %v252_v10 }
  0xdc   :  { %v254_v14 = vsel %vm244_vm10, nan, %v253_v12 }
  0xdd   :  { %v255_v17 = vpack.c.bf16 %v254_v14, %v151_v13 }
  0xdf   :  { %574 = vmatmul.mubr.bf16.vlgmr.msra.gmra.mxu0 %v255_v17 }
 0x19f   :  { %v361_v22 = vpop.f32.mrf.mxu0 }
 0x1a0   :  { %v362_v23 = vadd.f32 %v512_v24, %v361_v22 }
 0x1a1   :  { %v575_v26 = vpop.f32.mrf.mxu0 }
 0x1a2   :  { %v372_v28 = vmul.f32 %v371_v25, %v362_v23  ;;  %vm369_vm11 = vcmp.ge.f32.partialorder %v362_v23, 0.0 }
 0x1a3   :  { %v364_v27 = vpop.f32.mrf.mxu0 }
 0x1a4   :  { %v365_v29 = vadd.f32 %v512_v24, %v364_v27  ;;  %v374_v4 = vsel %vm369_vm11, %v362_v23, %v372_v28 }
 0x1a5   :  { %v576_v30 = vpop.f32.mrf.mxu0 }
 0x1a6   :  { %vm370_vm12 = vcmp.ge.f32.partialorder %v365_v29, 0.0  ;;  %v373_v32 = vmul.f32 %v371_v25, %v365_v29 }
 0x1a8   :  { %v375_v33 = vsel %vm370_vm12, %v365_v29, %v373_v32 }
 0x1a9   :  { %v376_v34 = vpack.c.bf16 %v375_v33, %v374_v4 }
 0x1ab   :  { %594 = vmatmul.mubr.bf16.vlgmr.msra.gmra.mxu1 %v376_v34 }
 0x26b   :  { %v482_v35 = vpop.f32.mrf.mxu1 }
 0x26c   :  { %v483_v15 = vadd.f32 %v521_v37, %v482_v35 }
 0x26d   :  { %v595_v39 = vpop.f32.mrf.mxu1 }
 0x26f   :  { %v485_v40 = vpop.f32.mrf.mxu1 }
 0x270   :  { %v486_v16 = vadd.f32 %v521_v37, %v485_v40 }
 0x271   :  { %v596_v41 = vpop.f32.mrf.mxu1 }
 0x272   :  { %v537_v36 = vpack.c.bf16 %v486_v16, %v483_v15 }
 0x274   :  { %538 = vst [vmem:[%s867_s7] sm:$0xff] %v537_v36  }

</bundles_post_ra>
